<compile_context>
chip_gen: v7x
topology: tpu7x:2x2x1
jax: 0.10.0
libtpu: 0.0.40
codegen_flags: <defaults>
</compile_context>

<pallas_src>
import jax
import jax.numpy as jnp
from jax.experimental import pallas as pl
from jax.experimental.pallas import tpu as pltpu

LANE = 128          # TPU lane width
HALF = LANE // 2    # two batch rows are packed per 128-lane output row


def _round_up(x, m):
    return (x + m - 1) // m * m


def _vmem_capacity_bytes():
    """Physical VMEM per TensorCore (v5e/v6e: 128 MiB, v7x: 64 MiB)."""
    try:
        cap = getattr(pltpu.get_tpu_info(), "vmem_capacity_bytes", None)
        if cap:
            return int(cap)
    except Exception:
        pass
    return 64 << 20   # conservative default = v7x


def _table_vmem_budget_bytes(cap):
    # Leave headroom for double-buffered output blocks, packed weight/bias,
    # the gathered-rows scratch and compiler temporaries.  v7x (64 MiB / TC)
    # gets a tighter fraction than v5e/v6e (128 MiB).
    frac = 0.5 if cap >= (96 << 20) else 0.4
    return int(cap * frac)


def _make_vmem_gather_kernel(tb, emb_dim):
    """Batch tile of TB rows; embedding table resident in VMEM."""

    def kernel(ids_ref, emb_ref, w_ref, b_ref, out_ref, rows_ref):
        # ids_ref  : (b_rows,)   int32, SMEM (scalar prefetch)
        # emb_ref  : (U, E)      f32, VMEM (resident, constant index_map)
        # w_ref    : (2E, 128)   f32, VMEM  block-diag [[W^T, 0], [0, W^T]]
        # b_ref    : (1, 128)    f32, VMEM  [b, b]
        # out_ref  : (TB/2, 128) f32, VMEM
        # rows_ref : (TB/2, 2E)  f32 scratch (two batch rows per scratch row)
        base = pl.program_id(0) * tb
        # In-VMEM gather: one dynamic-sublane row load per batch element,
        # stored directly in the packed (TB/2, 2E) layout.  Fully unrolled so
        # the LLO scheduler can interleave SMEM id loads with the row copies.
        for j in range(tb):
            row = ids_ref[base + j]
            rows_ref[pl.ds(j // 2, 1), pl.ds((j % 2) * emb_dim, emb_dim)] = (
                emb_ref[pl.ds(row, 1), :])
        out = jnp.dot(rows_ref[...], w_ref[...],
                      preferred_element_type=jnp.float32)
        out_ref[...] = (out + b_ref[...]).astype(out_ref.dtype)

    return kernel


def _make_hbm_gather_kernel(tb, emb_dim, n_valid, wave=16):
    """Fallback for tables too large for VMEM residency: gather rows from HBM
    on one shared DMA semaphore, in bounded waves, fully unrolled."""

    def kernel(ids_ref, emb_hbm, w_ref, b_ref, out_ref, rows_ref, sem):
        base = pl.program_id(0) * tb

        def row_copy(j):
            row = ids_ref[base + j]
            return pltpu.make_async_copy(
                emb_hbm.at[pl.ds(row, 1), :],
                rows_ref.at[pl.ds(j // 2, 1),
                            pl.ds((j % 2) * emb_dim, emb_dim)],
                sem)

        # The ragged tail tile skips DMAs for padded rows; zero the scratch
        # first so untouched lanes cannot inject NaN/Inf into the matmul.
        @pl.when(base + tb > n_valid)
        def _():
            rows_ref[...] = jnp.zeros_like(rows_ref)

        for w0 in range(0, tb, wave):
            wave_js = range(w0, min(w0 + wave, tb))
            for j in wave_js:                        # issue one bounded wave
                @pl.when(base + j < n_valid)
                def _(j=j):
                    row_copy(j).start()
            for j in wave_js:                        # wait for the wave with
                @pl.when(base + j < n_valid)         # the SAME descriptor
                def _(j=j):
                    row_copy(j).wait()

        # TODO(synk): double-buffer the HBM gather against the previous
        # tile's matmul/store (pl.ANY inputs are not auto-pipelined).
        out = jnp.dot(rows_ref[...], w_ref[...],
                      preferred_element_type=jnp.float32)
        out_ref[...] = (out + b_ref[...]).astype(out_ref.dtype)

    return kernel


def prepare_user_tower_params(emb_table, fc_weight, fc_bias):
    """One-time parameter prep (cast / transpose / two-row packing), hoisted
    out of the per-call path."""
    _, emb_dim = emb_table.shape
    out_dim, emb_dim2 = fc_weight.shape
    assert emb_dim == emb_dim2
    assert out_dim <= HALF, "two-row packing assumes fc output dim <= 64"
    wt = jnp.transpose(fc_weight).astype(jnp.float32)               # (E, O)
    w_pack = jnp.zeros((2 * emb_dim, LANE), jnp.float32)
    w_pack = w_pack.at[:emb_dim, :out_dim].set(wt)
    w_pack = w_pack.at[emb_dim:, HALF:HALF + out_dim].set(wt)
    b32 = fc_bias.astype(jnp.float32)
    b_pack = jnp.zeros((1, LANE), jnp.float32)
    b_pack = b_pack.at[0, :out_dim].set(b32)
    b_pack = b_pack.at[0, HALF:HALF + out_dim].set(b32)
    # Keep the table f32 so results match the reference at 1e-4; bf16 storage
    # (halves gather bytes / VMEM on v6e/v7x) is a drop-in if tolerated.
    return emb_table.astype(jnp.float32), w_pack, b_pack, out_dim


def user_tower(ids, emb, w_pack, b_pack, out_dim, *, tb=None):
    """ids: (B,) int; returns (B, out_dim) f32 == fc(embedding(ids))."""
    B = ids.shape[0]
    U, E = emb.shape

    # Batch-tile selection: >= 2 tiles so both v7x TensorCores get work, up to
    # 256-row tiles to amortize per-grid-step overhead on v5e/v6e.
    if tb is None:
        tb = min(256, _round_up(max(-(-B // 2), 16), 16))
    tb = max(16, _round_up(tb, 16))
    b_rows = _round_up(B, tb)
    n_tiles = b_rows // tb
    half_rows = b_rows // 2

    # Pad ids with a valid index (0); padded rows are sliced off below.
    ids_pad = jnp.zeros((b_rows,), jnp.int32).at[:B].set(ids.astype(jnp.int32))

    cap = _vmem_capacity_bytes()
    table_bytes = int(U * E * emb.dtype.itemsize)
    resident = table_bytes <= _table_vmem_budget_bytes(cap)

    fixed_bytes = 4 * (w_pack.size + b_pack.size          # weight + bias
                       + (tb // 2) * (2 * E)              # rows scratch
                       + 2 * (tb // 2) * LANE)            # double-buffered out
    need = fixed_bytes + (table_bytes if resident else 0)
    vmem_limit = int(min(max(need + (8 << 20), 32 << 20), int(cap * 0.9)))

    common_specs = [
        pl.BlockSpec((2 * E, LANE), lambda i, ids_s: (0, 0)),   # packed weight
        pl.BlockSpec((1, LANE), lambda i, ids_s: (0, 0)),       # packed bias
    ]
    out_spec = pl.BlockSpec((tb // 2, LANE), lambda i, ids_s: (i, 0))

    if resident:
        kernel = _make_vmem_gather_kernel(tb, E)
        emb_spec = pl.BlockSpec((U, E), lambda i, ids_s: (0, 0))  # VMEM-resident
        scratch = [pltpu.VMEM((tb // 2, 2 * E), jnp.float32)]
        bytes_accessed = (table_bytes + 4 * b_rows
                          + 4 * half_rows * LANE + fixed_bytes)
    else:
        kernel = _make_hbm_gather_kernel(tb, E, B)
        emb_spec = pl.BlockSpec(memory_space=pl.ANY)              # stays in HBM
        scratch = [pltpu.VMEM((tb // 2, 2 * E), jnp.float32),
                   pltpu.SemaphoreType.DMA]
        bytes_accessed = (4 * b_rows * E + 4 * b_rows
                          + 4 * half_rows * LANE + fixed_bytes)

    out_packed = pl.pallas_call(
        kernel,
        out_shape=jax.ShapeDtypeStruct((half_rows, LANE), jnp.float32),
        grid_spec=pltpu.PrefetchScalarGridSpec(
            num_scalar_prefetch=1,                     # ids -> SMEM
            grid=(n_tiles,),
            in_specs=[emb_spec] + common_specs,
            out_specs=out_spec,
            scratch_shapes=scratch,
        ),
        compiler_params=pltpu.CompilerParams(
            dimension_semantics=("parallel",),
            vmem_limit_bytes=vmem_limit),
        cost_estimate=pl.CostEstimate(
            flops=int(2 * half_rows * (2 * E) * LANE),
            transcendentals=0,
            bytes_accessed=int(bytes_accessed)),
    )(ids_pad, emb, w_pack, b_pack)

    # Free contiguous view: (b_rows/2, 128) -> (b_rows, 64), then slice batch.
    return out_packed.reshape(b_rows, HALF)[:B, :out_dim]


def reference(ids, emb_table, fc_weight, fc_bias):
    emb = jnp.take(emb_table, ids, axis=0)             # (B, E)
    return emb @ fc_weight.T + fc_bias[None, :]        # (B, 64)


if __name__ == "__main__":
    key = jax.random.PRNGKey(0)
    k1, k2, k3, k4 = jax.random.split(key, 4)

    user_dim = 128        # embedding vocab size
    embedding_dim = 32
    out_dim = 64
    batch = 64

    # Deterministic synthetic parameters (match nn.Embedding / nn.Linear shapes).
    emb_table = jax.random.normal(k1, (user_dim, embedding_dim), jnp.float32)
    fc_weight = jax.random.normal(k2, (out_dim, embedding_dim), jnp.float32) * 0.1
    fc_bias = jax.random.normal(k3, (out_dim,), jnp.float32) * 0.01
    ids = jax.random.randint(k4, (batch,), 0, user_dim, jnp.int32)

    # One-time prep (cast / transpose / two-row pack) outside the per-call path.
    emb_f32, w_pack, b_pack, odim = prepare_user_tower_params(
        emb_table, fc_weight, fc_bias)

    # Default tb gives 2 grid tiles for this small batch (both v7x TCs busy);
    # production batches use 256-row tiles automatically.
    out = user_tower(ids, emb_f32, w_pack, b_pack, odim)
    out = jax.block_until_ready(out)

    ref = reference(ids, emb_table, fc_weight, fc_bias)
    assert out.shape == (batch, out_dim)
    assert jnp.allclose(out, ref, atol=1e-4, rtol=1e-4), "mismatch vs reference"

    print("KERNEL_OK")
</pallas_src>

<mosaic_0001>
module attributes {stable_mosaic.version = 11 : i64} {
  func.func @kernel(%arg0: i32, %arg1: memref<64xi32, #tpu.memory_space<smem>>, %arg2: memref<128x32xf32, #tpu.memory_space<vmem>>, %arg3: memref<64x128xf32, #tpu.memory_space<vmem>>, %arg4: memref<1x128xf32, #tpu.memory_space<vmem>>, %arg5: memref<16x128xf32, #tpu.memory_space<vmem>>, %arg6: memref<16x64xf32, #tpu.memory_space<vmem>>) attributes {dimension_semantics = [#tpu.dimension_semantics<parallel>], iteration_bounds = array<i64: 2>, scalar_prefetch = 1 : i64, scratch_operands = 1 : i64, tpu.core_type = #tpu.core_type<tc>, window_params = [{pipeline_mode = #tpu.pipeline_mode<synchronous>, transform_indices = @transform_0, window_bounds = array<i64: 128, 32>}, {pipeline_mode = #tpu.pipeline_mode<synchronous>, transform_indices = @transform_1, window_bounds = array<i64: 64, 128>}, {pipeline_mode = #tpu.pipeline_mode<synchronous>, transform_indices = @transform_2, window_bounds = array<i64: 1, 128>}, {transform_indices = @transform_3, window_bounds = array<i64: 16, 128>}]} {
    %c32_i32 = arith.constant 32 : i32
    %0 = arith.muli %arg0, %c32_i32 : i32
    %c0_i32 = arith.constant 0 : i32
    %1 = arith.addi %0, %c0_i32 : i32
    %2 = arith.index_cast %1 : i32 to index
    %3 = memref.load %arg1[%2] : memref<64xi32, #tpu.memory_space<smem>>
    %4 = arith.index_cast %3 : i32 to index
    %c0 = arith.constant 0 : index
    %5 = vector.load %arg2[%4, %c0] : memref<128x32xf32, #tpu.memory_space<vmem>>, vector<1x32xf32>
    %c0_0 = arith.constant 0 : index
    %c0_1 = arith.constant 0 : index
    %6 = vector.load %arg6[%c0_0, %c0_1] : memref<16x64xf32, #tpu.memory_space<vmem>>, vector<1x32xf32>
    tpu.vector_store %arg6[%c0_0, %c0_1], %5 {strides = array<i32>} : memref<16x64xf32, #tpu.memory_space<vmem>>, vector<1x32xf32>,
    %c1_i32 = arith.constant 1 : i32
    %7 = arith.addi %0, %c1_i32 : i32
    %8 = arith.index_cast %7 : i32 to index
    %9 = memref.load %arg1[%8] : memref<64xi32, #tpu.memory_space<smem>>
    %10 = arith.index_cast %9 : i32 to index
    %c0_2 = arith.constant 0 : index
    %11 = vector.load %arg2[%10, %c0_2] : memref<128x32xf32, #tpu.memory_space<vmem>>, vector<1x32xf32>
    %c0_3 = arith.constant 0 : index
    %c32 = arith.constant 32 : index
    %12 = vector.load %arg6[%c0_3, %c32] : memref<16x64xf32, #tpu.memory_space<vmem>>, vector<1x32xf32>
    tpu.vector_store %arg6[%c0_3, %c32], %11 {strides = array<i32>} : memref<16x64xf32, #tpu.memory_space<vmem>>, vector<1x32xf32>,
    %c2_i32 = arith.constant 2 : i32
    %13 = arith.addi %0, %c2_i32 : i32
    %14 = arith.index_cast %13 : i32 to index
    %15 = memref.load %arg1[%14] : memref<64xi32, #tpu.memory_space<smem>>
    %16 = arith.index_cast %15 : i32 to index
    %c0_4 = arith.constant 0 : index
    %17 = vector.load %arg2[%16, %c0_4] : memref<128x32xf32, #tpu.memory_space<vmem>>, vector<1x32xf32>
    %c1 = arith.constant 1 : index
    %c0_5 = arith.constant 0 : index
    %18 = vector.load %arg6[%c1, %c0_5] : memref<16x64xf32, #tpu.memory_space<vmem>>, vector<1x32xf32>
    tpu.vector_store %arg6[%c1, %c0_5], %17 {strides = array<i32>} : memref<16x64xf32, #tpu.memory_space<vmem>>, vector<1x32xf32>,
    %c3_i32 = arith.constant 3 : i32
    %19 = arith.addi %0, %c3_i32 : i32
    %20 = arith.index_cast %19 : i32 to index
    %21 = memref.load %arg1[%20] : memref<64xi32, #tpu.memory_space<smem>>
    %22 = arith.index_cast %21 : i32 to index
    %c0_6 = arith.constant 0 : index
    %23 = vector.load %arg2[%22, %c0_6] : memref<128x32xf32, #tpu.memory_space<vmem>>, vector<1x32xf32>
    %c1_7 = arith.constant 1 : index
    %c32_8 = arith.constant 32 : index
    %24 = vector.load %arg6[%c1_7, %c32_8] : memref<16x64xf32, #tpu.memory_space<vmem>>, vector<1x32xf32>
    tpu.vector_store %arg6[%c1_7, %c32_8], %23 {strides = array<i32>} : memref<16x64xf32, #tpu.memory_space<vmem>>, vector<1x32xf32>,
    %c4_i32 = arith.constant 4 : i32
    %25 = arith.addi %0, %c4_i32 : i32
    %26 = arith.index_cast %25 : i32 to index
    %27 = memref.load %arg1[%26] : memref<64xi32, #tpu.memory_space<smem>>
    %28 = arith.index_cast %27 : i32 to index
    %c0_9 = arith.constant 0 : index
    %29 = vector.load %arg2[%28, %c0_9] : memref<128x32xf32, #tpu.memory_space<vmem>>, vector<1x32xf32>
    %c2 = arith.constant 2 : index
    %c0_10 = arith.constant 0 : index
    %30 = vector.load %arg6[%c2, %c0_10] : memref<16x64xf32, #tpu.memory_space<vmem>>, vector<1x32xf32>
    tpu.vector_store %arg6[%c2, %c0_10], %29 {strides = array<i32>} : memref<16x64xf32, #tpu.memory_space<vmem>>, vector<1x32xf32>,
    %c5_i32 = arith.constant 5 : i32
    %31 = arith.addi %0, %c5_i32 : i32
    %32 = arith.index_cast %31 : i32 to index
    %33 = memref.load %arg1[%32] : memref<64xi32, #tpu.memory_space<smem>>
    %34 = arith.index_cast %33 : i32 to index
    %c0_11 = arith.constant 0 : index
    %35 = vector.load %arg2[%34, %c0_11] : memref<128x32xf32, #tpu.memory_space<vmem>>, vector<1x32xf32>
    %c2_12 = arith.constant 2 : index
    %c32_13 = arith.constant 32 : index
    %36 = vector.load %arg6[%c2_12, %c32_13] : memref<16x64xf32, #tpu.memory_space<vmem>>, vector<1x32xf32>
    tpu.vector_store %arg6[%c2_12, %c32_13], %35 {strides = array<i32>} : memref<16x64xf32, #tpu.memory_space<vmem>>, vector<1x32xf32>,
    %c6_i32 = arith.constant 6 : i32
    %37 = arith.addi %0, %c6_i32 : i32
    %38 = arith.index_cast %37 : i32 to index
    %39 = memref.load %arg1[%38] : memref<64xi32, #tpu.memory_space<smem>>
    %40 = arith.index_cast %39 : i32 to index
    %c0_14 = arith.constant 0 : index
    %41 = vector.load %arg2[%40, %c0_14] : memref<128x32xf32, #tpu.memory_space<vmem>>, vector<1x32xf32>
    %c3 = arith.constant 3 : index
    %c0_15 = arith.constant 0 : index
    %42 = vector.load %arg6[%c3, %c0_15] : memref<16x64xf32, #tpu.memory_space<vmem>>, vector<1x32xf32>
    tpu.vector_store %arg6[%c3, %c0_15], %41 {strides = array<i32>} : memref<16x64xf32, #tpu.memory_space<vmem>>, vector<1x32xf32>,
    %c7_i32 = arith.constant 7 : i32
    %43 = arith.addi %0, %c7_i32 : i32
    %44 = arith.index_cast %43 : i32 to index
    %45 = memref.load %arg1[%44] : memref<64xi32, #tpu.memory_space<smem>>
    %46 = arith.index_cast %45 : i32 to index
    %c0_16 = arith.constant 0 : index
    %47 = vector.load %arg2[%46, %c0_16] : memref<128x32xf32, #tpu.memory_space<vmem>>, vector<1x32xf32>
    %c3_17 = arith.constant 3 : index
    %c32_18 = arith.constant 32 : index
    %48 = vector.load %arg6[%c3_17, %c32_18] : memref<16x64xf32, #tpu.memory_space<vmem>>, vector<1x32xf32>
    tpu.vector_store %arg6[%c3_17, %c32_18], %47 {strides = array<i32>} : memref<16x64xf32, #tpu.memory_space<vmem>>, vector<1x32xf32>,
    %c8_i32 = arith.constant 8 : i32
    %49 = arith.addi %0, %c8_i32 : i32
    %50 = arith.index_cast %49 : i32 to index
    %51 = memref.load %arg1[%50] : memref<64xi32, #tpu.memory_space<smem>>
    %52 = arith.index_cast %51 : i32 to index
    %c0_19 = arith.constant 0 : index
    %53 = vector.load %arg2[%52, %c0_19] : memref<128x32xf32, #tpu.memory_space<vmem>>, vector<1x32xf32>
    %c4 = arith.constant 4 : index
    %c0_20 = arith.constant 0 : index
    %54 = vector.load %arg6[%c4, %c0_20] : memref<16x64xf32, #tpu.memory_space<vmem>>, vector<1x32xf32>
    tpu.vector_store %arg6[%c4, %c0_20], %53 {strides = array<i32>} : memref<16x64xf32, #tpu.memory_space<vmem>>, vector<1x32xf32>,
    %c9_i32 = arith.constant 9 : i32
    %55 = arith.addi %0, %c9_i32 : i32
    %56 = arith.index_cast %55 : i32 to index
    %57 = memref.load %arg1[%56] : memref<64xi32, #tpu.memory_space<smem>>
    %58 = arith.index_cast %57 : i32 to index
    %c0_21 = arith.constant 0 : index
    %59 = vector.load %arg2[%58, %c0_21] : memref<128x32xf32, #tpu.memory_space<vmem>>, vector<1x32xf32>
    %c4_22 = arith.constant 4 : index
    %c32_23 = arith.constant 32 : index
    %60 = vector.load %arg6[%c4_22, %c32_23] : memref<16x64xf32, #tpu.memory_space<vmem>>, vector<1x32xf32>
    tpu.vector_store %arg6[%c4_22, %c32_23], %59 {strides = array<i32>} : memref<16x64xf32, #tpu.memory_space<vmem>>, vector<1x32xf32>,
    %c10_i32 = arith.constant 10 : i32
    %61 = arith.addi %0, %c10_i32 : i32
    %62 = arith.index_cast %61 : i32 to index
    %63 = memref.load %arg1[%62] : memref<64xi32, #tpu.memory_space<smem>>
    %64 = arith.index_cast %63 : i32 to index
    %c0_24 = arith.constant 0 : index
    %65 = vector.load %arg2[%64, %c0_24] : memref<128x32xf32, #tpu.memory_space<vmem>>, vector<1x32xf32>
    %c5 = arith.constant 5 : index
    %c0_25 = arith.constant 0 : index
    %66 = vector.load %arg6[%c5, %c0_25] : memref<16x64xf32, #tpu.memory_space<vmem>>, vector<1x32xf32>
    tpu.vector_store %arg6[%c5, %c0_25], %65 {strides = array<i32>} : memref<16x64xf32, #tpu.memory_space<vmem>>, vector<1x32xf32>,
    %c11_i32 = arith.constant 11 : i32
    %67 = arith.addi %0, %c11_i32 : i32
    %68 = arith.index_cast %67 : i32 to index
    %69 = memref.load %arg1[%68] : memref<64xi32, #tpu.memory_space<smem>>
    %70 = arith.index_cast %69 : i32 to index
    %c0_26 = arith.constant 0 : index
    %71 = vector.load %arg2[%70, %c0_26] : memref<128x32xf32, #tpu.memory_space<vmem>>, vector<1x32xf32>
    %c5_27 = arith.constant 5 : index
    %c32_28 = arith.constant 32 : index
    %72 = vector.load %arg6[%c5_27, %c32_28] : memref<16x64xf32, #tpu.memory_space<vmem>>, vector<1x32xf32>
    tpu.vector_store %arg6[%c5_27, %c32_28], %71 {strides = array<i32>} : memref<16x64xf32, #tpu.memory_space<vmem>>, vector<1x32xf32>,
    %c12_i32 = arith.constant 12 : i32
    %73 = arith.addi %0, %c12_i32 : i32
    %74 = arith.index_cast %73 : i32 to index
    %75 = memref.load %arg1[%74] : memref<64xi32, #tpu.memory_space<smem>>
    %76 = arith.index_cast %75 : i32 to index
    %c0_29 = arith.constant 0 : index
    %77 = vector.load %arg2[%76, %c0_29] : memref<128x32xf32, #tpu.memory_space<vmem>>, vector<1x32xf32>
    %c6 = arith.constant 6 : index
    %c0_30 = arith.constant 0 : index
    %78 = vector.load %arg6[%c6, %c0_30] : memref<16x64xf32, #tpu.memory_space<vmem>>, vector<1x32xf32>
    tpu.vector_store %arg6[%c6, %c0_30], %77 {strides = array<i32>} : memref<16x64xf32, #tpu.memory_space<vmem>>, vector<1x32xf32>,
    %c13_i32 = arith.constant 13 : i32
    %79 = arith.addi %0, %c13_i32 : i32
    %80 = arith.index_cast %79 : i32 to index
    %81 = memref.load %arg1[%80] : memref<64xi32, #tpu.memory_space<smem>>
    %82 = arith.index_cast %81 : i32 to index
    %c0_31 = arith.constant 0 : index
    %83 = vector.load %arg2[%82, %c0_31] : memref<128x32xf32, #tpu.memory_space<vmem>>, vector<1x32xf32>
    %c6_32 = arith.constant 6 : index
    %c32_33 = arith.constant 32 : index
    %84 = vector.load %arg6[%c6_32, %c32_33] : memref<16x64xf32, #tpu.memory_space<vmem>>, vector<1x32xf32>
    tpu.vector_store %arg6[%c6_32, %c32_33], %83 {strides = array<i32>} : memref<16x64xf32, #tpu.memory_space<vmem>>, vector<1x32xf32>,
    %c14_i32 = arith.constant 14 : i32
    %85 = arith.addi %0, %c14_i32 : i32
    %86 = arith.index_cast %85 : i32 to index
    %87 = memref.load %arg1[%86] : memref<64xi32, #tpu.memory_space<smem>>
    %88 = arith.index_cast %87 : i32 to index
    %c0_34 = arith.constant 0 : index
    %89 = vector.load %arg2[%88, %c0_34] : memref<128x32xf32, #tpu.memory_space<vmem>>, vector<1x32xf32>
    %c7 = arith.constant 7 : index
    %c0_35 = arith.constant 0 : index
    %90 = vector.load %arg6[%c7, %c0_35] : memref<16x64xf32, #tpu.memory_space<vmem>>, vector<1x32xf32>
    tpu.vector_store %arg6[%c7, %c0_35], %89 {strides = array<i32>} : memref<16x64xf32, #tpu.memory_space<vmem>>, vector<1x32xf32>,
    %c15_i32 = arith.constant 15 : i32
    %91 = arith.addi %0, %c15_i32 : i32
    %92 = arith.index_cast %91 : i32 to index
    %93 = memref.load %arg1[%92] : memref<64xi32, #tpu.memory_space<smem>>
    %94 = arith.index_cast %93 : i32 to index
    %c0_36 = arith.constant 0 : index
    %95 = vector.load %arg2[%94, %c0_36] : memref<128x32xf32, #tpu.memory_space<vmem>>, vector<1x32xf32>
    %c7_37 = arith.constant 7 : index
    %c32_38 = arith.constant 32 : index
    %96 = vector.load %arg6[%c7_37, %c32_38] : memref<16x64xf32, #tpu.memory_space<vmem>>, vector<1x32xf32>
    tpu.vector_store %arg6[%c7_37, %c32_38], %95 {strides = array<i32>} : memref<16x64xf32, #tpu.memory_space<vmem>>, vector<1x32xf32>,
    %c16_i32 = arith.constant 16 : i32
    %97 = arith.addi %0, %c16_i32 : i32
    %98 = arith.index_cast %97 : i32 to index
    %99 = memref.load %arg1[%98] : memref<64xi32, #tpu.memory_space<smem>>
    %100 = arith.index_cast %99 : i32 to index
    %c0_39 = arith.constant 0 : index
    %101 = vector.load %arg2[%100, %c0_39] : memref<128x32xf32, #tpu.memory_space<vmem>>, vector<1x32xf32>
    %c8 = arith.constant 8 : index
    %c0_40 = arith.constant 0 : index
    %102 = vector.load %arg6[%c8, %c0_40] : memref<16x64xf32, #tpu.memory_space<vmem>>, vector<1x32xf32>
    tpu.vector_store %arg6[%c8, %c0_40], %101 {strides = array<i32>} : memref<16x64xf32, #tpu.memory_space<vmem>>, vector<1x32xf32>,
    %c17_i32 = arith.constant 17 : i32
    %103 = arith.addi %0, %c17_i32 : i32
    %104 = arith.index_cast %103 : i32 to index
    %105 = memref.load %arg1[%104] : memref<64xi32, #tpu.memory_space<smem>>
    %106 = arith.index_cast %105 : i32 to index
    %c0_41 = arith.constant 0 : index
    %107 = vector.load %arg2[%106, %c0_41] : memref<128x32xf32, #tpu.memory_space<vmem>>, vector<1x32xf32>
    %c8_42 = arith.constant 8 : index
    %c32_43 = arith.constant 32 : index
    %108 = vector.load %arg6[%c8_42, %c32_43] : memref<16x64xf32, #tpu.memory_space<vmem>>, vector<1x32xf32>
    tpu.vector_store %arg6[%c8_42, %c32_43], %107 {strides = array<i32>} : memref<16x64xf32, #tpu.memory_space<vmem>>, vector<1x32xf32>,
    %c18_i32 = arith.constant 18 : i32
    %109 = arith.addi %0, %c18_i32 : i32
    %110 = arith.index_cast %109 : i32 to index
    %111 = memref.load %arg1[%110] : memref<64xi32, #tpu.memory_space<smem>>
    %112 = arith.index_cast %111 : i32 to index
    %c0_44 = arith.constant 0 : index
    %113 = vector.load %arg2[%112, %c0_44] : memref<128x32xf32, #tpu.memory_space<vmem>>, vector<1x32xf32>
    %c9 = arith.constant 9 : index
    %c0_45 = arith.constant 0 : index
    %114 = vector.load %arg6[%c9, %c0_45] : memref<16x64xf32, #tpu.memory_space<vmem>>, vector<1x32xf32>
    tpu.vector_store %arg6[%c9, %c0_45], %113 {strides = array<i32>} : memref<16x64xf32, #tpu.memory_space<vmem>>, vector<1x32xf32>,
    %c19_i32 = arith.constant 19 : i32
    %115 = arith.addi %0, %c19_i32 : i32
    %116 = arith.index_cast %115 : i32 to index
    %117 = memref.load %arg1[%116] : memref<64xi32, #tpu.memory_space<smem>>
    %118 = arith.index_cast %117 : i32 to index
    %c0_46 = arith.constant 0 : index
    %119 = vector.load %arg2[%118, %c0_46] : memref<128x32xf32, #tpu.memory_space<vmem>>, vector<1x32xf32>
    %c9_47 = arith.constant 9 : index
    %c32_48 = arith.constant 32 : index
    %120 = vector.load %arg6[%c9_47, %c32_48] : memref<16x64xf32, #tpu.memory_space<vmem>>, vector<1x32xf32>
    tpu.vector_store %arg6[%c9_47, %c32_48], %119 {strides = array<i32>} : memref<16x64xf32, #tpu.memory_space<vmem>>, vector<1x32xf32>,
    %c20_i32 = arith.constant 20 : i32
    %121 = arith.addi %0, %c20_i32 : i32
    %122 = arith.index_cast %121 : i32 to index
    %123 = memref.load %arg1[%122] : memref<64xi32, #tpu.memory_space<smem>>
    %124 = arith.index_cast %123 : i32 to index
    %c0_49 = arith.constant 0 : index
    %125 = vector.load %arg2[%124, %c0_49] : memref<128x32xf32, #tpu.memory_space<vmem>>, vector<1x32xf32>
    %c10 = arith.constant 10 : index
    %c0_50 = arith.constant 0 : index
    %126 = vector.load %arg6[%c10, %c0_50] : memref<16x64xf32, #tpu.memory_space<vmem>>, vector<1x32xf32>
    tpu.vector_store %arg6[%c10, %c0_50], %125 {strides = array<i32>} : memref<16x64xf32, #tpu.memory_space<vmem>>, vector<1x32xf32>,
    %c21_i32 = arith.constant 21 : i32
    %127 = arith.addi %0, %c21_i32 : i32
    %128 = arith.index_cast %127 : i32 to index
    %129 = memref.load %arg1[%128] : memref<64xi32, #tpu.memory_space<smem>>
    %130 = arith.index_cast %129 : i32 to index
    %c0_51 = arith.constant 0 : index
    %131 = vector.load %arg2[%130, %c0_51] : memref<128x32xf32, #tpu.memory_space<vmem>>, vector<1x32xf32>
    %c10_52 = arith.constant 10 : index
    %c32_53 = arith.constant 32 : index
    %132 = vector.load %arg6[%c10_52, %c32_53] : memref<16x64xf32, #tpu.memory_space<vmem>>, vector<1x32xf32>
    tpu.vector_store %arg6[%c10_52, %c32_53], %131 {strides = array<i32>} : memref<16x64xf32, #tpu.memory_space<vmem>>, vector<1x32xf32>,
    %c22_i32 = arith.constant 22 : i32
    %133 = arith.addi %0, %c22_i32 : i32
    %134 = arith.index_cast %133 : i32 to index
    %135 = memref.load %arg1[%134] : memref<64xi32, #tpu.memory_space<smem>>
    %136 = arith.index_cast %135 : i32 to index
    %c0_54 = arith.constant 0 : index
    %137 = vector.load %arg2[%136, %c0_54] : memref<128x32xf32, #tpu.memory_space<vmem>>, vector<1x32xf32>
    %c11 = arith.constant 11 : index
    %c0_55 = arith.constant 0 : index
    %138 = vector.load %arg6[%c11, %c0_55] : memref<16x64xf32, #tpu.memory_space<vmem>>, vector<1x32xf32>
    tpu.vector_store %arg6[%c11, %c0_55], %137 {strides = array<i32>} : memref<16x64xf32, #tpu.memory_space<vmem>>, vector<1x32xf32>,
    %c23_i32 = arith.constant 23 : i32
    %139 = arith.addi %0, %c23_i32 : i32
    %140 = arith.index_cast %139 : i32 to index
    %141 = memref.load %arg1[%140] : memref<64xi32, #tpu.memory_space<smem>>
    %142 = arith.index_cast %141 : i32 to index
    %c0_56 = arith.constant 0 : index
    %143 = vector.load %arg2[%142, %c0_56] : memref<128x32xf32, #tpu.memory_space<vmem>>, vector<1x32xf32>
    %c11_57 = arith.constant 11 : index
    %c32_58 = arith.constant 32 : index
    %144 = vector.load %arg6[%c11_57, %c32_58] : memref<16x64xf32, #tpu.memory_space<vmem>>, vector<1x32xf32>
    tpu.vector_store %arg6[%c11_57, %c32_58], %143 {strides = array<i32>} : memref<16x64xf32, #tpu.memory_space<vmem>>, vector<1x32xf32>,
    %c24_i32 = arith.constant 24 : i32
    %145 = arith.addi %0, %c24_i32 : i32
    %146 = arith.index_cast %145 : i32 to index
    %147 = memref.load %arg1[%146] : memref<64xi32, #tpu.memory_space<smem>>
    %148 = arith.index_cast %147 : i32 to index
    %c0_59 = arith.constant 0 : index
    %149 = vector.load %arg2[%148, %c0_59] : memref<128x32xf32, #tpu.memory_space<vmem>>, vector<1x32xf32>
    %c12 = arith.constant 12 : index
    %c0_60 = arith.constant 0 : index
    %150 = vector.load %arg6[%c12, %c0_60] : memref<16x64xf32, #tpu.memory_space<vmem>>, vector<1x32xf32>
    tpu.vector_store %arg6[%c12, %c0_60], %149 {strides = array<i32>} : memref<16x64xf32, #tpu.memory_space<vmem>>, vector<1x32xf32>,
    %c25_i32 = arith.constant 25 : i32
    %151 = arith.addi %0, %c25_i32 : i32
    %152 = arith.index_cast %151 : i32 to index
    %153 = memref.load %arg1[%152] : memref<64xi32, #tpu.memory_space<smem>>
    %154 = arith.index_cast %153 : i32 to index
    %c0_61 = arith.constant 0 : index
    %155 = vector.load %arg2[%154, %c0_61] : memref<128x32xf32, #tpu.memory_space<vmem>>, vector<1x32xf32>
    %c12_62 = arith.constant 12 : index
    %c32_63 = arith.constant 32 : index
    %156 = vector.load %arg6[%c12_62, %c32_63] : memref<16x64xf32, #tpu.memory_space<vmem>>, vector<1x32xf32>
    tpu.vector_store %arg6[%c12_62, %c32_63], %155 {strides = array<i32>} : memref<16x64xf32, #tpu.memory_space<vmem>>, vector<1x32xf32>,
    %c26_i32 = arith.constant 26 : i32
    %157 = arith.addi %0, %c26_i32 : i32
    %158 = arith.index_cast %157 : i32 to index
    %159 = memref.load %arg1[%158] : memref<64xi32, #tpu.memory_space<smem>>
    %160 = arith.index_cast %159 : i32 to index
    %c0_64 = arith.constant 0 : index
    %161 = vector.load %arg2[%160, %c0_64] : memref<128x32xf32, #tpu.memory_space<vmem>>, vector<1x32xf32>
    %c13 = arith.constant 13 : index
    %c0_65 = arith.constant 0 : index
    %162 = vector.load %arg6[%c13, %c0_65] : memref<16x64xf32, #tpu.memory_space<vmem>>, vector<1x32xf32>
    tpu.vector_store %arg6[%c13, %c0_65], %161 {strides = array<i32>} : memref<16x64xf32, #tpu.memory_space<vmem>>, vector<1x32xf32>,
    %c27_i32 = arith.constant 27 : i32
    %163 = arith.addi %0, %c27_i32 : i32
    %164 = arith.index_cast %163 : i32 to index
    %165 = memref.load %arg1[%164] : memref<64xi32, #tpu.memory_space<smem>>
    %166 = arith.index_cast %165 : i32 to index
    %c0_66 = arith.constant 0 : index
    %167 = vector.load %arg2[%166, %c0_66] : memref<128x32xf32, #tpu.memory_space<vmem>>, vector<1x32xf32>
    %c13_67 = arith.constant 13 : index
    %c32_68 = arith.constant 32 : index
    %168 = vector.load %arg6[%c13_67, %c32_68] : memref<16x64xf32, #tpu.memory_space<vmem>>, vector<1x32xf32>
    tpu.vector_store %arg6[%c13_67, %c32_68], %167 {strides = array<i32>} : memref<16x64xf32, #tpu.memory_space<vmem>>, vector<1x32xf32>,
    %c28_i32 = arith.constant 28 : i32
    %169 = arith.addi %0, %c28_i32 : i32
    %170 = arith.index_cast %169 : i32 to index
    %171 = memref.load %arg1[%170] : memref<64xi32, #tpu.memory_space<smem>>
    %172 = arith.index_cast %171 : i32 to index
    %c0_69 = arith.constant 0 : index
    %173 = vector.load %arg2[%172, %c0_69] : memref<128x32xf32, #tpu.memory_space<vmem>>, vector<1x32xf32>
    %c14 = arith.constant 14 : index
    %c0_70 = arith.constant 0 : index
    %174 = vector.load %arg6[%c14, %c0_70] : memref<16x64xf32, #tpu.memory_space<vmem>>, vector<1x32xf32>
    tpu.vector_store %arg6[%c14, %c0_70], %173 {strides = array<i32>} : memref<16x64xf32, #tpu.memory_space<vmem>>, vector<1x32xf32>,
    %c29_i32 = arith.constant 29 : i32
    %175 = arith.addi %0, %c29_i32 : i32
    %176 = arith.index_cast %175 : i32 to index
    %177 = memref.load %arg1[%176] : memref<64xi32, #tpu.memory_space<smem>>
    %178 = arith.index_cast %177 : i32 to index
    %c0_71 = arith.constant 0 : index
    %179 = vector.load %arg2[%178, %c0_71] : memref<128x32xf32, #tpu.memory_space<vmem>>, vector<1x32xf32>
    %c14_72 = arith.constant 14 : index
    %c32_73 = arith.constant 32 : index
    %180 = vector.load %arg6[%c14_72, %c32_73] : memref<16x64xf32, #tpu.memory_space<vmem>>, vector<1x32xf32>
    tpu.vector_store %arg6[%c14_72, %c32_73], %179 {strides = array<i32>} : memref<16x64xf32, #tpu.memory_space<vmem>>, vector<1x32xf32>,
    %c30_i32 = arith.constant 30 : i32
    %181 = arith.addi %0, %c30_i32 : i32
    %182 = arith.index_cast %181 : i32 to index
    %183 = memref.load %arg1[%182] : memref<64xi32, #tpu.memory_space<smem>>
    %184 = arith.index_cast %183 : i32 to index
    %c0_74 = arith.constant 0 : index
    %185 = vector.load %arg2[%184, %c0_74] : memref<128x32xf32, #tpu.memory_space<vmem>>, vector<1x32xf32>
    %c15 = arith.constant 15 : index
    %c0_75 = arith.constant 0 : index
    %186 = vector.load %arg6[%c15, %c0_75] : memref<16x64xf32, #tpu.memory_space<vmem>>, vector<1x32xf32>
    tpu.vector_store %arg6[%c15, %c0_75], %185 {strides = array<i32>} : memref<16x64xf32, #tpu.memory_space<vmem>>, vector<1x32xf32>,
    %c31_i32 = arith.constant 31 : i32
    %187 = arith.addi %0, %c31_i32 : i32
    %188 = arith.index_cast %187 : i32 to index
    %189 = memref.load %arg1[%188] : memref<64xi32, #tpu.memory_space<smem>>
    %190 = arith.index_cast %189 : i32 to index
    %c0_76 = arith.constant 0 : index
    %191 = vector.load %arg2[%190, %c0_76] : memref<128x32xf32, #tpu.memory_space<vmem>>, vector<1x32xf32>
    %c15_77 = arith.constant 15 : index
    %c32_78 = arith.constant 32 : index
    %192 = vector.load %arg6[%c15_77, %c32_78] : memref<16x64xf32, #tpu.memory_space<vmem>>, vector<1x32xf32>
    tpu.vector_store %arg6[%c15_77, %c32_78], %191 {strides = array<i32>} : memref<16x64xf32, #tpu.memory_space<vmem>>, vector<1x32xf32>,
    %c0_79 = arith.constant 0 : index
    %c0_80 = arith.constant 0 : index
    %193 = vector.load %arg6[%c0_79, %c0_80] : memref<16x64xf32, #tpu.memory_space<vmem>>, vector<16x64xf32>
    %c0_81 = arith.constant 0 : index
    %c0_82 = arith.constant 0 : index
    %194 = vector.load %arg3[%c0_81, %c0_82] : memref<64x128xf32, #tpu.memory_space<vmem>>, vector<64x128xf32>
    %cst = arith.constant dense<0.000000e+00> : vector<16x128xf32>
    %195 = tpu.matmul %193, %194, %cst {dimension_numbers = #tpu.dot_dimension_numbers<[1], [0], [0], [1], [0, 0, 1, 1], [], []>} : vector<16x64xf32>, vector<64x128xf32>, vector<16x128xf32> -> vector<16x128xf32>
    %c0_83 = arith.constant 0 : index
    %c0_84 = arith.constant 0 : index
    %196 = vector.load %arg4[%c0_83, %c0_84] : memref<1x128xf32, #tpu.memory_space<vmem>>, vector<1x128xf32>
    %197 = vector.broadcast %196 : vector<1x128xf32> to vector<16x128xf32>
    %198 = arith.addf %195, %197 : vector<16x128xf32>
    %c0_85 = arith.constant 0 : index
    %c0_86 = arith.constant 0 : index
    %199 = vector.load %arg5[%c0_85, %c0_86] : memref<16x128xf32, #tpu.memory_space<vmem>>, vector<16x128xf32>
    tpu.vector_store %arg5[%c0_85, %c0_86], %198 {strides = array<i32>} : memref<16x128xf32, #tpu.memory_space<vmem>>, vector<16x128xf32>,
    return
  }
  func.func @transform_0(%arg0: i32, %arg1: memref<64xi32, #tpu.memory_space<smem>>) -> (i32, i32) {
    %c0_i32 = arith.constant 0 : i32
    %c0_i32_0 = arith.constant 0 : i32
    %c0_i32_1 = arith.constant 0 : i32
    return %c0_i32, %c0_i32_0 : i32, i32
  }
  func.func @transform_1(%arg0: i32, %arg1: memref<64xi32, #tpu.memory_space<smem>>) -> (i32, i32) {
    %c0_i32 = arith.constant 0 : i32
    %c0_i32_0 = arith.constant 0 : i32
    %c0_i32_1 = arith.constant 0 : i32
    return %c0_i32, %c0_i32_0 : i32, i32
  }
  func.func @transform_2(%arg0: i32, %arg1: memref<64xi32, #tpu.memory_space<smem>>) -> (i32, i32) {
    %c0_i32 = arith.constant 0 : i32
    %c0_i32_0 = arith.constant 0 : i32
    %c0_i32_1 = arith.constant 0 : i32
    return %c0_i32, %c0_i32_0 : i32, i32
  }
  func.func @transform_3(%arg0: i32, %arg1: memref<64xi32, #tpu.memory_space<smem>>) -> (i32, i32) {
    %c0_i32 = arith.constant 0 : i32
    %c0_i32_0 = arith.constant 0 : i32
    return %arg0, %c0_i32 : i32, i32
  }
}

</mosaic_0001>

<bundles_post_ra>
// kernel: tpu_custom_call.1
= control target key start
LH: loop header
LB: loop body
LE: loop exit
PB: predicated region body
PF: predicated region fallthrough
CT: control target
= control target key end

     0   :  { %s1157_s0 = inlined_call_operand.vmem [shape: s32[64], index: 0, kind: input, shape index: {}]   ;;  %s1158_s1 = inlined_call_operand.vmem [shape: f32[128,32], index: 1, kind: input, shape index: {}]   ;;  %s1159_s2 = inlined_call_operand.vmem [shape: f32[64,128], index: 2, kind: input, shape index: {}]   ;;  %s1160_s3 = inlined_call_operand.vmem [shape: f32[1,128], index: 3, kind: input, shape index: {}]   ;;  %s1161_s4 = inlined_call_operand.hbm [shape: f32[32,128], index: 4, kind: output, shape index: {}]  }
   0x1   :  { %1168 = sst [smem:[#allocation13_spill]] %s1159_s2  ;;  %s9_s17 = sshll.u32 %s1157_s0, 4  ;;  %s10_s17 = int_to_ptr.vmem [resolvable:$true] %s9_s17 }
   0x2   :  { %s682_s18 = scalar_lea.vmem %s10_s17, 16  ;;  %p687_p1 = scmp.lt.s32.totalorder %s10_s17, %s10_s17 }
   0x3   :  { %p683_p0 = scmp.ne.s32.totalorder %s10_s17, %s682_s18  ;;  %p688_p2 = scmp.lt.s32.totalorder %s682_s18, %s682_s18 }
   0x5   :  { %p689_p3 = por %p688_p2, %p687_p1 }
   0x7   :  { %p690_p4 = pnand %p689_p3, %p683_p0 }
   0x9   :  { %693 = shalt.err (!%p690_p4)  }
   0xa   :  { %s760_s19 = smov [#allocation4]  }
   0xb   :  { %12 = dma.vmem_to_smem %s10_s17, 16, %s760_s19, [#allocation3] }
   0xc   :  { %738 = dma.done.wait [#allocation3], 16 }
   0xd   :  { %739 = vsyncadd [#allocation3], 4294967280 }
   0xe   :  { %14 = sfence }
   0xf   :  { %15 = vsyncpa [#allocation6], 0 }
  0x10   :  { %17 = vsyncpa [#allocation6 + $0x1], 0  ;;  %s793_s20 = smov 0   ;;  %s795_s21 = smov 0  }
  0x11   :  { %s797_s0 = smov 0   ;;  %s799_s22 = smov 0  }
  0x12 LB: > { %1169 = sst [smem:[#allocation9_spill]] %s754_s0  ;;  %s814_s23 = sadd.s32 4294967295, %s758_s22   ;;  %s758_s22 = sphi %s799_s22, %s1178_s22   ;;  %s754_s0 = sphi %s797_s0, %s1180_s0   ;;  %s750_s21 = sphi %s795_s21, %s1182_s21   ;;  %s746_s20 = sphi %s793_s20, %s1181_s20  }
  0x13   : > { %s580_s24 = sadd.s32 4294967294, %s758_s22   ;;  %s818_s25 = sadd.s32 1, %s758_s22  }
  0x14   : > { %1170 = sst [smem:[#allocation10_spill]] %s818_s25  ;;  %s93_s26 = sadd.s32 1, %s754_s0 }
  0x15   : > { %s90_s27 = ssub.s32 %s758_s22, %s818_s25  ;;  %p103_p5 = scmp.ne.s32.totalorder %s754_s0, %s750_s21 }
  0x16   : > { %p91_p6 = scmp.eq.s32.totalorder %s90_s27, 0  ;;  %p104_p7 = scmp.eq.s32.totalorder %s814_s23, 1 }
  0x17   : > { %p109_p8 = scmp.ne.s32.totalorder %s750_s21, %s746_s20  ;;  %p110_p9 = scmp.eq.s32.totalorder %s580_s24, 1 }
  0x18   : > { %s829_s28 = scalar_select %p91_p6, %s754_s0, %s93_s26  }
  0x19   : > { %p831_p10 = por %p104_p7, %p103_p5  ;;  %p835_p11 = por %p110_p9, %p109_p8 }
  0x1a   : > { %1171 = sst [smem:[#allocation11_spill]] %s829_s28  ;;  %p582_p12 = scmp.ge.s32.totalorder %s758_s22, 1 }
  0x1b   : > { %s1173_s30 = scalar_select %p835_p11, 1, 0 }
  0x1c   : > { %p137_p13 = scmp.lt.s32.totalorder %s758_s22, 3 }
  0x1d   : > { %1174 = sst [smem:[#allocation12_spill]] %s1173_s30 }
  0x1e   : > { %p138_p0 = pnand %p582_p12, %p137_p13 }
  0x1f   : > { %s842_s5 = sshll.u32 (!%p138_p0), %s814_s23, 5  ;;  %s1176_s2 = sld [smem:[#allocation13_spill]] (!%p138_p0)  ;;  %vm161_vm0 = vcmask (!%p138_p0), 253952   ;;  %vm171_vm1 = vcmask (!%p138_p0), 516352   ;;  %vm400_vm2 = vcmask (!%p138_p0), 523264  }
  0x20   : > { %141 = sbr.rel (%p138_p0) target bundleno = 423 (0x1a7), region = 32  ;;  %s192_s6 = sadd.s32 (!%p138_p0), 5, %s842_s5  ;;  %v585_v62 = vld [vmem:[%s1160_s3] ss:$0 sm:$0xff] (!%p138_p0) }
  0x21   : > { %s163_s7 = sadd.s32 (!%p138_p0), 1, %s842_s5  ;;  %s193_s8 = sld [smem:[#allocation4 + %s192_s6]] (!%p138_p0) }
  0x22   : > { %s164_s9 = sld [smem:[#allocation4 + %s163_s7]] (!%p138_p0)  ;;  %s206_s10 = sadd.s32 (!%p138_p0), 7, %s842_s5 }
  0x23   : > { %s178_s11 = sadd.s32 (!%p138_p0), 3, %s842_s5  ;;  %s207_s12 = sld [smem:[#allocation4 + %s206_s10]] (!%p138_p0) }
  0x24   : > { %s179_s13 = sld [smem:[#allocation4 + %s178_s11]] (!%p138_p0)  ;;  %s234_s14 = sadd.s32 (!%p138_p0), 11, %s842_s5 }
  0x25   : > { %s220_s15 = sadd.s32 (!%p138_p0), 9, %s842_s5  ;;  %s850_s16 = sld [smem:[#allocation4 + %s234_s14]] (!%p138_p0)  ;;  %v385_v4 = vld [vmem:[%s1176_s2] sm:$0xff] (!%p138_p0)  ;;  %v386_v5 = vld [vmem:[%s1176_s2 + $0x8] sm:$0xff] (!%p138_p0)  ;;  %v387_v9 = vld [vmem:[%s1176_s2 + $0x10] sm:$0xff] (!%p138_p0) }
  0x26   : > { %s852_s17 = sld [smem:[#allocation4 + %s220_s15]] (!%p138_p0)  ;;  %s262_s18 = sadd.s32 (!%p138_p0), 15, %s842_s5  ;;  %v623_v8 = vpack.c.bf16 (!%p138_p0), %v386_v5, %v385_v4  ;;  %v388_v10 = vld [vmem:[%s1176_s2 + $0x18] sm:$0xff] (!%p138_p0)  ;;  %v389_v14 = vld [vmem:[%s1176_s2 + $0x20] sm:$0xff] (!%p138_p0)  ;;  %v390_v15 = vld [vmem:[%s1176_s2 + $0x28] sm:$0xff] (!%p138_p0) }
  0x27   : > { %s248_s19 = sadd.s32 13, %s842_s5  ;;  %s194_s27 = scalar_lea.vmem %s1158_s1, %s193_s8  ;;  %v627_v13 = vpack.c.bf16 %v388_v10, %v387_v9  ;;  %v631_v18 = vpack.c.bf16 %v390_v15, %v389_v14  ;;  %v391_v19 = vld [vmem:[%s1176_s2 + $0x30] sm:$0xff]  ;;  %v392_v20 = vld [vmem:[%s1176_s2 + $0x38] sm:$0xff] }
  0x28   : > { %s165_s10 = scalar_lea.vmem %s1158_s1, %s164_s9  ;;  %v195_v0 = vld [vmem:[%s194_s27] sm:$0x1]  ;;  %s862_s11 = sld [smem:[#allocation4 + %s262_s18]]  ;;  %624 = vmatprep.subr.bf16.mxu0 %v623_v8  ;;  %v635_v23 = vpack.c.bf16 %v392_v20, %v391_v19 }
  0x29   : > { %v166_v1 = vld [vmem:[%s165_s10] sm:$0x1]  ;;  %s864_s14 = sld [smem:[#allocation4 + %s248_s19]]  ;;  %s1163_s15 = smov 32   ;;  %626 = vmatpush3.bf16.msra.mxu0 %v623_v8 }
  0x2a   : > { %197 = vrot.lane.b32.xlu1 %v195_v0, %s1163_s15  ;;  %168 = vrot.lane.b32.xlu0 %v166_v1, %s1163_s15  ;;  %s208_s26 = scalar_lea.vmem %s1158_s1, %s207_s12  ;;  %s180_s9 = scalar_lea.vmem %s1158_s1, %s179_s13 }
  0x2b   : > { %v209_v2 = vld [vmem:[%s208_s26] sm:$0x1]  ;;  %s290_s18 = sadd.s32 19, %s842_s5  ;;  %s276_s19 = sadd.s32 17, %s842_s5  ;;  %628 = vmatprep.subr.bf16.mxu0 %v627_v13 }
  0x2c   : > { %v181_v3 = vld [vmem:[%s180_s9] sm:$0x1]  ;;  %s236_s28 = scalar_lea.vmem %s1158_s1, %s850_s16  ;;  %s222_s25 = scalar_lea.vmem %s1158_s1, %s852_s17 }
  0x2d   : > { %s884_s12 = sld [smem:[#allocation4 + %s290_s18]]  ;;  %s1175_s13 = smov 32   ;;  %v237_v6 = vld [vmem:[%s236_s28] sm:$0x1]  ;;  %630 = vmatpush3.bf16.msra.mxu0 %v627_v13 }
  0x2e   : > { %s886_s24 = sld [smem:[#allocation4 + %s276_s19]]  ;;  %211 = vrot.lane.b32.xlu1 %v209_v2, %s1175_s13  ;;  %183 = vrot.lane.b32.xlu0 %v181_v3, %s1175_s13  ;;  %s318_s8 = sadd.s32 23, %s842_s5  ;;  %v223_v7 = vld [vmem:[%s222_s25] sm:$0x1] }
  0x2f   : > { %s304_s26 = sadd.s32 21, %s842_s5  ;;  %s264_s15 = scalar_lea.vmem %s1158_s1, %s862_s11  ;;  %632 = vmatprep.subr.bf16.mxu0 %v631_v18 }
  0x30   : > { %s250_s27 = scalar_lea.vmem %s1158_s1, %s864_s14  ;;  %s906_s10 = sld [smem:[#allocation4 + %s318_s8]]  ;;  %v265_v11 = vld [vmem:[%s264_s15] sm:$0x1] }
  0x31   : > { %s908_s6 = sld [smem:[#allocation4 + %s304_s26]]  ;;  %s346_s7 = sadd.s32 27, %s842_s5  ;;  %v251_v12 = vld [vmem:[%s250_s27] sm:$0x1]  ;;  %634 = vmatpush3.bf16.msra.mxu0 %v631_v18 }
  0x32   : > { %s332_s28 = sadd.s32 25, %s842_s5  ;;  %239 = vrot.lane.b32.xlu1 %v237_v6, %s1175_s13  ;;  %225 = vrot.lane.b32.xlu0 %v223_v7, %s1175_s13  ;;  %s914_s25 = sld [smem:[#allocation4 + %s346_s7]] }
  0x33   : > { %s916_s11 = sld [smem:[#allocation4 + %s332_s28]]  ;;  %s292_s17 = scalar_lea.vmem %s1158_s1, %s884_s12  ;;  %636 = vmatprep.subr.bf16.mxu0 %v635_v23 }
  0x34   : > { %s278_s7 = scalar_lea.vmem %s1158_s1, %s886_s24  ;;  %s374_s28 = sadd.s32 31, %s842_s5  ;;  %v293_v16 = vld [vmem:[%s292_s17] sm:$0x1] }
  0x35   : > { %s360_s14 = sadd.s32 29, %s842_s5  ;;  %s934_s16 = sld [smem:[#allocation4 + %s374_s28]]  ;;  %v279_v17 = vld [vmem:[%s278_s7] sm:$0x1]  ;;  %638 = vmatpush3.bf16.msra.mxu0 %v635_v23 }
  0x36   : > { %s936_s15 = sld [smem:[#allocation4 + %s360_s14]]  ;;  %267 = vrot.lane.b32.xlu1 %v265_v11, %s1175_s13  ;;  %253 = vrot.lane.b32.xlu0 %v251_v12, %s1175_s13  ;;  %s320_s27 = scalar_lea.vmem %s1158_s1, %s906_s10 }
  0x37   : > { %s306_s9 = scalar_lea.vmem %s1158_s1, %s908_s6  ;;  %s187_s14 = sadd.s32 4, %s842_s5  ;;  %v321_v21 = vld [vmem:[%s320_s27] sm:$0x1] }
  0x38   : > { %s158_s30 = sld [smem:[#allocation4 + %s842_s5]]  ;;  %s348_s6 = scalar_lea.vmem %s1158_s1, %s914_s25  ;;  %v307_v22 = vld [vmem:[%s306_s9] sm:$0x1] }
  0x39   : > { %s334_s26 = scalar_lea.vmem %s1158_s1, %s916_s11  ;;  %s964_s0 = sld [smem:[#allocation4 + %s187_s14]]  ;;  %v349_v25 = vld [vmem:[%s348_s6] sm:$0x1] }
  0x3a   : > { %s201_s18 = sadd.s32 6, %s842_s5  ;;  %295 = vrot.lane.b32.xlu1 %v293_v16, %s1175_s13  ;;  %281 = vrot.lane.b32.xlu0 %v279_v17, %s1175_s13  ;;  %s173_s7 = sadd.s32 2, %s842_s5  ;;  %v335_v26 = vld [vmem:[%s334_s26] sm:$0x1] }
  0x3b   : > { %s969_s17 = sld [smem:[#allocation4 + %s201_s18]]  ;;  %s376_s12 = scalar_lea.vmem %s1158_s1, %s934_s16 }
  0x3c   : > { %s362_s18 = scalar_lea.vmem %s1158_s1, %s936_s15  ;;  %s986_s19 = sld [smem:[#allocation4 + %s173_s7]]  ;;  %v377_v29 = vld [vmem:[%s376_s12] sm:$0x1] }
  0x3d   : > { %s229_s28 = sadd.s32 10, %s842_s5  ;;  %s215_s11 = sadd.s32 8, %s842_s5  ;;  %v363_v30 = vld [vmem:[%s362_s18] sm:$0x1] }
  0x3e   : > { %s159_s27 = scalar_lea.vmem %s1158_s1, %s158_s30  ;;  %s992_s9 = sld [smem:[#allocation4 + %s229_s28]]  ;;  %323 = vrot.lane.b32.xlu1 %v321_v21, %s1175_s13  ;;  %309 = vrot.lane.b32.xlu0 %v307_v22, %s1175_s13 }
  0x3f   : > { %v160_v24 = vld [vmem:[%s159_s27] sm:$0x1]  ;;  %s257_s14 = sadd.s32 14, %s842_s5  ;;  %s189_s30 = scalar_lea.vmem %s1158_s1, %s964_s0 }
  0x40   : > { %162 = vst.msk [vmem:[#allocation2] sm:$0x1] %vm161_vm0, %v160_v24  ;;  %s216_s8 = sld [smem:[#allocation4 + %s215_s11]]  ;;  %v190_v27 = vld [vmem:[%s189_s30] sm:$0x1]  ;;  %s243_s6 = sadd.s32 12, %s842_s5 }
  0x41   : > { %s203_s10 = scalar_lea.vmem %s1158_s1, %s969_s17  ;;  %s258_s27 = sld [smem:[#allocation4 + %s257_s14]]  ;;  %191 = vst.msk [vmem:[#allocation2 + $0x2] sm:$0x1] %vm161_vm0, %v190_v27 }
  0x42   : > { %v204_v28 = vld [vmem:[%s203_s10] sm:$0x1]  ;;  %s285_s26 = sadd.s32 18, %s842_s5  ;;  %351 = vrot.lane.b32.xlu1 %v349_v25, %s1175_s13  ;;  %337 = vrot.lane.b32.xlu0 %v335_v26, %s1175_s13  ;;  %s175_s7 = scalar_lea.vmem %s1158_s1, %s986_s19 }
  0x43   : > { %205 = vst.msk [vmem:[#allocation2 + $0x3] sm:$0x1] %vm161_vm0, %v204_v28  ;;  %s244_s24 = sld [smem:[#allocation4 + %s243_s6]]  ;;  %v176_v31 = vld [vmem:[%s175_s7] sm:$0x1]  ;;  %s271_s12 = sadd.s32 16, %s842_s5 }
  0x44   : > { %s231_s2 = scalar_lea.vmem %s1158_s1, %s992_s9  ;;  %s286_s16 = sld [smem:[#allocation4 + %s285_s26]]  ;;  %177 = vst.msk [vmem:[#allocation2 + $0x1] sm:$0x1] %vm161_vm0, %v176_v31 }
  0x45   : > { %v232_v32 = vld [vmem:[%s231_s2] sm:$0x1]  ;;  %s313_s0 = sadd.s32 22, %s842_s5  ;;  %s272_s18 = sld [smem:[#allocation4 + %s271_s12]] }
  0x46   : > { %233 = vst.msk [vmem:[#allocation2 + $0x5] sm:$0x1] %vm161_vm0, %v232_v32  ;;  %s217_s15 = scalar_lea.vmem %s1158_s1, %s216_s8  ;;  %379 = vrot.lane.b32.xlu1 %v377_v29, %s1175_s13  ;;  %365 = vrot.lane.b32.xlu0 %v363_v30, %s1175_s13  ;;  %s314_s11 = sld [smem:[#allocation4 + %s313_s0]] }
  0x47   : > { %v218_v33 = vld [vmem:[%s217_s15] sm:$0x1]  ;;  %s259_s2 = scalar_lea.vmem %s1158_s1, %s258_s27  ;;  %s299_s17 = sadd.s32 20, %s842_s5 }
  0x48   : > { %219 = vst.msk [vmem:[#allocation2 + $0x4] sm:$0x1] %vm161_vm0, %v218_v33  ;;  %v260_v34 = vld [vmem:[%s259_s2] sm:$0x1]  ;;  %s341_s14 = sadd.s32 26, %s842_s5  ;;  %s300_s13 = sld [smem:[#allocation4 + %s299_s17]] }
  0x49   : > { %261 = vst.msk [vmem:[#allocation2 + $0x7] sm:$0x1] %vm161_vm0, %v260_v34  ;;  %s245_s30 = scalar_lea.vmem %s1158_s1, %s244_s24  ;;  %s342_s27 = sld [smem:[#allocation4 + %s341_s14]] }
  0x4a   : > { %v246_v35 = vld [vmem:[%s245_s30] sm:$0x1]  ;;  %s287_s10 = scalar_lea.vmem %s1158_s1, %s286_s16  ;;  %s327_s12 = sadd.s32 24, %s842_s5 }
  0x4b   : > { %247 = vst.msk [vmem:[#allocation2 + $0x6] sm:$0x1] %vm161_vm0, %v246_v35  ;;  %v288_v36 = vld [vmem:[%s287_s10] sm:$0x1]  ;;  %s369_s0 = sadd.s32 30, %s842_s5  ;;  %s273_s15 = scalar_lea.vmem %s1158_s1, %s272_s18 }
  0x4c   : > { %289 = vst.msk [vmem:[#allocation2 + $0x9] sm:$0x1] %vm161_vm0, %v288_v36  ;;  %s328_s24 = sld [smem:[#allocation4 + %s327_s12]]  ;;  %v274_v37 = vld [vmem:[%s273_s15] sm:$0x1]  ;;  %s315_s2 = scalar_lea.vmem %s1158_s1, %s314_s11 }
  0x4d   : > { %s370_s17 = sld [smem:[#allocation4 + %s369_s0]]  ;;  %275 = vst.msk [vmem:[#allocation2 + $0x8] sm:$0x1] %vm161_vm0, %v274_v37  ;;  %v316_v38 = vld [vmem:[%s315_s2] sm:$0x1]  ;;  %s355_s16 = sadd.s32 28, %s842_s5 }
  0x4e   : > { %317 = vst.msk [vmem:[#allocation2 + $0xb] sm:$0x1] %vm161_vm0, %v316_v38  ;;  %s301_s7 = scalar_lea.vmem %s1158_s1, %s300_s13  ;;  %s356_s30 = sld [smem:[#allocation4 + %s355_s16]] }
  0x4f   : > { %v302_v39 = vld [vmem:[%s301_s7] sm:$0x1]  ;;  %s343_s25 = scalar_lea.vmem %s1158_s1, %s342_s27  ;;  %s153_s15 = sand.u32 1, %s750_s21  }
  0x50   : > { %303 = vst.msk [vmem:[#allocation2 + $0xa] sm:$0x1] %vm161_vm0, %v302_v39  ;;  %v344_v40 = vld [vmem:[%s343_s25] sm:$0x1]  ;;  %s593_s16 = sshll.u32 %s814_s23, 8  ;;  %s762_s23 = smov [#allocation5]  }
  0x51   : > { %345 = vst.msk [vmem:[#allocation2 + $0xd] sm:$0x1] %vm161_vm0, %v344_v40  ;;  %s1114_s7 = scalar_lea.hbm %s1161_s4, %s593_s16  ;;  %s698_s28 = sshll.u32 %s762_s23, 4  ;;  %s699_s28 = int_to_ptr.vmem [resolvable:$false] %s698_s28 }
  0x52   : > { %s329_s5 = scalar_lea.vmem %s1158_s1, %s328_s24  ;;  %s583_s24 = sshll.u32 %s153_s15, 4 }
  0x53   : > { %v330_v41 = vld [vmem:[%s329_s5] sm:$0x1]  ;;  %s371_s13 = scalar_lea.vmem %s1158_s1, %s370_s17  ;;  %s155_s2 = scalar_lea.vmem [#allocation5], %s583_s24 }
  0x54   : > { %331 = vst.msk [vmem:[#allocation2 + $0xc] sm:$0x1] %vm161_vm0, %v330_v41  ;;  %v372_v42 = vld [vmem:[%s371_s13] sm:$0x1]  ;;  %s357_s6 = scalar_lea.vmem %s1158_s1, %s356_s30  ;;  %s498_s17 = sshll.u32 %s155_s2, 4  ;;  %s1109_s17 = int_to_ptr.vmem [resolvable:$true] %s498_s17 }
  0x55   : > { %373 = vst.msk [vmem:[#allocation2 + $0xf] sm:$0x1] %vm161_vm0, %v372_v42  ;;  %v358_v43 = vld [vmem:[%s357_s6] sm:$0x1]  ;;  %s1116_s30 = scalar_lea.sflag [#allocation6], %s153_s15  ;;  %s694_s18 = scalar_lea.vmem %s1109_s17, 256 }
  0x56   : > { %359 = vst.msk [vmem:[#allocation2 + $0xe] sm:$0x1] %vm161_vm0, %v358_v43  ;;  %p695_p1 = scmp.ne.s32.totalorder %s1109_s17, %s694_s18  ;;  %s700_s25 = scalar_lea.vmem %s699_s28, 512 }
  0x57   : > { %p701_p4 = scmp.lt.s32.totalorder %s1109_s17, %s699_s28  ;;  %p702_p5 = scmp.lt.s32.totalorder %s700_s25, %s694_s18 }
  0x58   : > { %p696_p2 = pnand %p695_p1, %p831_p10 }
  0x59   : > { %p703_p6 = por %p702_p5, %p701_p4 }
  0x5a   : > { %p697_p3 = pneg %p696_p2 }
  0x5c   : > { %p704_p7 = pnand %p703_p6, %p697_p3 }
  0x9c   : > { %v198_v44 = vpop.permute.xlu1 %197  ;;  %v169_v45 = vpop.permute.xlu0 %168 }
  0x9d   : > { %200 = vst.msk [vmem:[#allocation2 + $0x2] sm:$0x1] %vm171_vm1, %v198_v44  ;;  %172 = vst.msk [vmem:[#allocation2] sm:$0x1] %vm171_vm1, %v169_v45 }
  0xa0   : > { %v212_v46 = vpop.permute.xlu1 %211  ;;  %v184_v47 = vpop.permute.xlu0 %183 }
  0xa1   : > { %214 = vst.msk [vmem:[#allocation2 + $0x3] sm:$0x1] %vm171_vm1, %v212_v46  ;;  %186 = vst.msk [vmem:[#allocation2 + $0x1] sm:$0x1] %vm171_vm1, %v184_v47 }
  0xa4   : > { %v240_v48 = vpop.permute.xlu1 %239  ;;  %v226_v49 = vpop.permute.xlu0 %225 }
  0xa5   : > { %242 = vst.msk [vmem:[#allocation2 + $0x5] sm:$0x1] %vm171_vm1, %v240_v48  ;;  %228 = vst.msk [vmem:[#allocation2 + $0x4] sm:$0x1] %vm171_vm1, %v226_v49 }
  0xa8   : > { %v268_v50 = vpop.permute.xlu1 %267  ;;  %v254_v51 = vpop.permute.xlu0 %253 }
  0xa9   : > { %270 = vst.msk [vmem:[#allocation2 + $0x7] sm:$0x1] %vm171_vm1, %v268_v50  ;;  %256 = vst.msk [vmem:[#allocation2 + $0x6] sm:$0x1] %vm171_vm1, %v254_v51 }
  0xac   : > { %v296_v52 = vpop.permute.xlu1 %295  ;;  %v282_v53 = vpop.permute.xlu0 %281 }
  0xad   : > { %298 = vst.msk [vmem:[#allocation2 + $0x9] sm:$0x1] %vm171_vm1, %v296_v52  ;;  %284 = vst.msk [vmem:[#allocation2 + $0x8] sm:$0x1] %vm171_vm1, %v282_v53 }
  0xb0   : > { %v324_v54 = vpop.permute.xlu1 %323  ;;  %v310_v55 = vpop.permute.xlu0 %309  ;;  %v383_v56 = vld [vmem:[#allocation2] sm:$0xff] }
  0xb1   : > { %326 = vst.msk [vmem:[#allocation2 + $0xb] sm:$0x1] %vm171_vm1, %v324_v54  ;;  %312 = vst.msk [vmem:[#allocation2 + $0xa] sm:$0x1] %vm171_vm1, %v310_v55  ;;  %620 = vmatprep.mubr.msk.f32.mxu0 %vm400_vm2, %v383_v56 }
  0xb4   : > { %v352_v57 = vpop.permute.xlu1 %351  ;;  %v338_v58 = vpop.permute.xlu0 %337 }
  0xb5   : > { %354 = vst.msk [vmem:[#allocation2 + $0xd] sm:$0x1] %vm171_vm1, %v352_v57  ;;  %340 = vst.msk [vmem:[#allocation2 + $0xc] sm:$0x1] %vm171_vm1, %v338_v58 }
  0xb8   : > { %v380_v59 = vpop.permute.xlu1 %379  ;;  %v366_v60 = vpop.permute.xlu0 %365 }
  0xb9   : > { %382 = vst.msk [vmem:[#allocation2 + $0xf] sm:$0x1] %vm171_vm1, %v380_v59  ;;  %368 = vst.msk [vmem:[#allocation2 + $0xe] sm:$0x1] %vm171_vm1, %v366_v60 }
  0xc0   : > { %v384_v61 = vld [vmem:[#allocation2 + $0x8] sm:$0xff] }
  0xc1   : > { %621 = vmatmul.mubr.msk.f32.vlgmr.msra.gmra.mrb[0].mxu0 %vm400_vm2, %v384_v61 }
 0x194   : > { %v622_v63 = vpop.f32.mrb[0].mxu0 }
 0x195   : > { %v479_v0 = vadd.f32 %v622_v63, %v585_v62  ;;  %v473_v1 = vpop.f32.mrb[1].mxu0 }
 0x196   : > { %v474_v2 = vadd.f32 %v585_v62, %v473_v1 }
 0x197   : > { %483 = vst [vmem:[%s155_s2 + $0x8] sm:$0xff] %v479_v0 }
 0x198   : > { %482 = vst [vmem:[%s155_s2] sm:$0xff] %v474_v2 }
 0x199   : > { %707 = shalt.err (!%p704_p7)
}
 0x19a   : > { %s708_s11 = scalar_lea.hbm %s1114_s7, 256  ;;  %s712_s12 = scalar_lea.hbm %s1161_s4, 512 }
 0x19b   : > { %p709_p8 = scmp.ne.s32.totalorder %s1114_s7, %s708_s11  ;;  %p713_p13 = scmp.lt.u32.totalorder %s1114_s7, %s1161_s4 }
 0x19c   : > { %p714_p0 = scmp.lt.u32.totalorder %s712_s12, %s708_s11  ;;  %p716_p2 = scmp.lt.u32.totalorder %s708_s11, %s1114_s7 }
 0x19d   : > { %p710_p9 = pnand %p709_p8, %p831_p10 }
 0x19e   : > { %p715_p1 = por %p714_p0, %p713_p13 }
 0x19f   : > { %p711_p12 = pneg %p710_p9 }
 0x1a0   : > { %p717_p3 = por %p716_p2, %p715_p1 }
 0x1a2   : > { %p718_p4 = pnand %p717_p3, %p711_p12 }
 0x1a4   : > { %721 = shalt.err (!%p718_p4)
}
 0x1a5   : > { %s763_s27 = smov 128   ;;  %s764_s19 = smov 8  }
 0x1a6   : > { %639 = dma.vmem_to_hbm [thread:$0]  (%p831_p10), %s1109_s17, 256, %s1114_s7, %s1116_s30, %s763_s27, %s763_s27, %s764_s19  }
 0x1a7 PF: > { %p645_p5 = scmp.ge.s32.totalorder %s758_s22, 2  ;;  %s513_s15 = sand.u32 1, %s746_s20  }
 0x1a8   : > { %s514_s24 = scalar_lea.sflag [#allocation6], %s513_s15 }
 0x1a9   : > { %p642_p6 = pnand %p645_p5, %p835_p11 }
 0x1ab   : > { %741 = dma.done.wait (!%p642_p6), %s514_s24, 256  }
 0x1ac   : > { %743 = vsyncadd (!%p642_p6), %s514_s24, 4294967040  ;;  %s1178_s22 = sld [smem:[#allocation10_spill]]  ;;  %s1179_s9 = sld [smem:[#allocation9_spill]] }
 0x1ad   : > { %s1180_s0 = sld [smem:[#allocation11_spill]]  ;;  %s1181_s20 = smov %s750_s21 }
 0x1b2   : > { %p20_p7 = scmp.ge.s32.totalorder %s1178_s22, 4   ;;  %s1182_s21 = smov %s1179_s9 }
 0x1b4   :  { %22 = sbr.rel (!%p20_p7) target bundleno = 18 (0x12), region = 96 }
 0x1bb   :  { %519 = vsyncpa [#allocation6], 1 }
 0x1bc   :  { %521 = vsyncpa [#allocation6 + $0x1], 1 }

</bundles_post_ra>
